<compile_context>
chip_gen: v7x
topology: tpu7x:2x2x1
jax: 0.10.0
libtpu: 0.0.40
codegen_flags: <defaults>
</compile_context>

<pallas_src>
import math
from functools import partial

import jax
import jax.numpy as jnp
from jax.experimental import pallas as pl
from jax.experimental.pallas import tpu as pltpu


def cosnet_kernel(x_ref, wt_ref, invw_ref, label_ref, o_ref, *, scale, margin):
    x = x_ref[...]          # (TM, Din)   f32
    wt = wt_ref[...]        # (Din, TN)   f32  (pre-transposed weight tile)
    inv_w = invw_ref[...]   # (1, TN)     f32  (precomputed 1/||W_j||, 0 for pad)
    lbl = label_ref[...]    # (TM, 1)     int32

    # MXU matmul on the raw (un-normalized) operands: (TM,Din) @ (Din,TN).
    raw = jnp.dot(x, wt, preferred_element_type=jnp.float32)      # (TM, TN)

    # Row inverse-norm of x: one cross-lane reduction + EUP rsqrt per row.
    inv_x = jax.lax.rsqrt(jnp.sum(x * x, axis=-1, keepdims=True))  # (TM, 1)

    # Fused normalization epilogue (two VPU multiplies on the output tile).
    cos = raw * inv_x * inv_w                                      # (TM, TN)

    # Margin + scale fused into a single select (no float one_hot tile).
    col0 = pl.program_id(1) * o_ref.shape[1]
    classes = col0 + jax.lax.broadcasted_iota(jnp.int32, cos.shape, 1)
    scaled = scale * cos
    o_ref[...] = jnp.where(classes == lbl, scaled - scale * margin, scaled)


def _round_up(v, m):
    return ((v + m - 1) // m) * m


def cosnet_forward(x, weight, label, scale=100.0, margin=0.6182):
    B, dim_in = x.shape
    dim_out = weight.shape[0]

    # --- host-side layout plumbing (pure data movement, no extra math) -----
    # Pad batch to a sublane multiple and classes to a lane-dense multiple.
    b_p = _round_up(max(B, 1), 8)
    dout_p = _round_up(dim_out, 128)
    if b_p > 128:
        b_p = _round_up(b_p, 128)

    x_p = jnp.pad(x.astype(jnp.float32), ((0, b_p - B), (0, 0)))
    w_p = jnp.pad(weight.astype(jnp.float32), ((0, dout_p - dim_out), (0, 0)))
    label_p = jnp.pad(label.astype(jnp.int32).reshape(B, 1),
                      ((0, b_p - B), (0, 0)), constant_values=-1)

    # Pre-transpose weight to (Din, Dout_pad) so the MXU gets (M,K)x(K,N).
    w_t = w_p.T

    # Precompute per-class inverse norms once (static weights); padded rows
    # have zero norm -> force 0 so no inf/nan lands in the padded columns.
    w_sq = jnp.sum(w_p * w_p, axis=1)                     # (Dout_pad,)
    inv_w = jnp.where(w_sq > 0.0, jax.lax.rsqrt(w_sq), 0.0).reshape(1, dout_p)

    # --- tiling -------------------------------------------------------------
    tm = b_p if b_p <= 128 else 128
    tn = 512 if dout_p % 512 == 0 else (256 if dout_p % 256 == 0 else 128)
    grid = (b_p // tm, dout_p // tn)

    kernel = partial(cosnet_kernel, scale=float(scale), margin=float(margin))
    out_p = pl.pallas_call(
        kernel,
        out_shape=jax.ShapeDtypeStruct((b_p, dout_p), jnp.float32),
        grid=grid,
        in_specs=[
            pl.BlockSpec((tm, dim_in), lambda i, j: (i, 0)),   # x tile (reused over j)
            pl.BlockSpec((dim_in, tn), lambda i, j: (0, j)),   # weight tile
            pl.BlockSpec((1, tn), lambda i, j: (0, j)),        # inv ||W|| tile
            pl.BlockSpec((tm, 1), lambda i, j: (i, 0)),        # labels
        ],
        out_specs=pl.BlockSpec((tm, tn), lambda i, j: (i, j)),
        compiler_params=pltpu.CompilerParams(
            dimension_semantics=("parallel", "parallel"),
        ),
    )(x_p, w_t, inv_w, label_p)

    # Slice the lane/sublane padding back off.
    return out_p[:B, :dim_out]


def cosnet_reference(x, weight, label, scale=100.0, margin=0.6182):
    dim_out = weight.shape[0]
    xn = x / jnp.linalg.norm(x, axis=1, keepdims=True)
    logits = xn @ weight.T
    logits = logits / jnp.linalg.norm(weight, axis=1, keepdims=True).T
    one_h = jax.nn.one_hot(label, dim_out, dtype=jnp.float32)
    return scale * (logits - margin * one_h)


if __name__ == "__main__":
    # Module defaults: dim_in=128, dim_out=75; small batch.
    B, dim_in, dim_out = 8, 128, 75
    scale, margin = 100.0, 0.6182

    key = jax.random.PRNGKey(0)
    k_x, k_w, k_l = jax.random.split(key, 3)

    x = jax.random.normal(k_x, (B, dim_in), dtype=jnp.float32)
    # Deterministic nn.Linear-style init: U(-1/sqrt(dim_in), 1/sqrt(dim_in)).
    bound = 1.0 / math.sqrt(dim_in)
    weight = jax.random.uniform(
        k_w, (dim_out, dim_in), dtype=jnp.float32, minval=-bound, maxval=bound
    )
    label = jax.random.randint(k_l, (B,), 0, dim_out, dtype=jnp.int32)

    out = cosnet_forward(x, weight, label, scale=scale, margin=margin)
    out = jax.block_until_ready(out)

    ref = cosnet_reference(x, weight, label, scale=scale, margin=margin)
    assert out.shape == (B, dim_out)
    assert bool(jnp.all(jnp.isfinite(out))), "non-finite values in output"
    assert jnp.allclose(out, ref, rtol=1e-5, atol=1e-4), "mismatch vs reference"

    print("KERNEL_OK")
</pallas_src>

<mosaic_0001>
module attributes {stable_mosaic.version = 11 : i64} {
  func.func @cosnet_kernel(%arg0: i32, %arg1: i32, %arg2: memref<8x128xf32, #tpu.memory_space<vmem>>, %arg3: memref<128x128xf32, #tpu.memory_space<vmem>>, %arg4: memref<1x128xf32, #tpu.memory_space<vmem>>, %arg5: memref<8x1xi32, #tpu.memory_space<vmem>>, %arg6: memref<8x128xf32, #tpu.memory_space<vmem>>) attributes {dimension_semantics = [#tpu.dimension_semantics<parallel>, #tpu.dimension_semantics<parallel>], iteration_bounds = array<i64: 1, 1>, scalar_prefetch = 0 : i64, scratch_operands = 0 : i64, tpu.core_type = #tpu.core_type<tc>, window_params = [{transform_indices = @transform_0, window_bounds = array<i64: 8, 128>}, {transform_indices = @transform_1, window_bounds = array<i64: 128, 128>}, {transform_indices = @transform_2, window_bounds = array<i64: 1, 128>}, {transform_indices = @transform_3, window_bounds = array<i64: 8, 1>}, {transform_indices = @transform_4, window_bounds = array<i64: 8, 128>}]} {
    %c0 = arith.constant 0 : index
    %c0_0 = arith.constant 0 : index
    %0 = vector.load %arg2[%c0, %c0_0] : memref<8x128xf32, #tpu.memory_space<vmem>>, vector<8x128xf32>
    %c0_1 = arith.constant 0 : index
    %c0_2 = arith.constant 0 : index
    %1 = vector.load %arg3[%c0_1, %c0_2] : memref<128x128xf32, #tpu.memory_space<vmem>>, vector<128x128xf32>
    %c0_3 = arith.constant 0 : index
    %c0_4 = arith.constant 0 : index
    %2 = vector.load %arg4[%c0_3, %c0_4] : memref<1x128xf32, #tpu.memory_space<vmem>>, vector<1x128xf32>
    %c0_5 = arith.constant 0 : index
    %c0_6 = arith.constant 0 : index
    %3 = vector.load %arg5[%c0_5, %c0_6] : memref<8x1xi32, #tpu.memory_space<vmem>>, vector<8x1xi32>
    %cst = arith.constant dense<0.000000e+00> : vector<8x128xf32>
    %4 = tpu.matmul %0, %1, %cst {dimension_numbers = #tpu.dot_dimension_numbers<[1], [0], [0], [1], [0, 0, 1, 1], [], []>} : vector<8x128xf32>, vector<128x128xf32>, vector<8x128xf32> -> vector<8x128xf32>
    %5 = arith.mulf %0, %0 : vector<8x128xf32>
    %cst_7 = arith.constant dense<0.000000e+00> : vector<8xf32>
    %6 = vector.multi_reduction <add>, %5, %cst_7 [1] : vector<8x128xf32> to vector<8xf32>
    %7 = vector.shape_cast %6 : vector<8xf32> to vector<8x1xf32>
    %8 = math.rsqrt %7 : vector<8x1xf32>
    %9 = vector.broadcast %8 : vector<8x1xf32> to vector<8x128xf32>
    %10 = arith.mulf %4, %9 : vector<8x128xf32>
    %11 = vector.broadcast %2 : vector<1x128xf32> to vector<8x128xf32>
    %12 = arith.mulf %10, %11 : vector<8x128xf32>
    %c128_i32 = arith.constant 128 : i32
    %13 = arith.muli %arg1, %c128_i32 : i32
    %14 = tpu.iota {dimensions = array<i32: 1>} : vector<8x128xi32>
    %15 = vector.broadcast %13 : i32 to vector<8x128xi32>
    %16 = arith.addi %15, %14 : vector<8x128xi32>
    %cst_8 = arith.constant 1.000000e+02 : f32
    %17 = vector.broadcast %cst_8 : f32 to vector<8x128xf32>
    %18 = arith.mulf %17, %12 : vector<8x128xf32>
    %19 = vector.broadcast %3 : vector<8x1xi32> to vector<8x128xi32>
    %20 = arith.cmpi eq, %16, %19 : vector<8x128xi32>
    %cst_9 = arith.constant 6.182000e+01 : f32
    %21 = vector.broadcast %cst_9 : f32 to vector<8x128xf32>
    %22 = arith.subf %18, %21 : vector<8x128xf32>
    %23 = arith.select %20, %22, %18 : vector<8x128xi1>, vector<8x128xf32>
    %c0_10 = arith.constant 0 : index
    %c0_11 = arith.constant 0 : index
    %24 = vector.load %arg6[%c0_10, %c0_11] : memref<8x128xf32, #tpu.memory_space<vmem>>, vector<8x128xf32>
    tpu.vector_store %arg6[%c0_10, %c0_11], %23 {strides = array<i32>} : memref<8x128xf32, #tpu.memory_space<vmem>>, vector<8x128xf32>,
    return
  }
  func.func @transform_0(%arg0: i32, %arg1: i32) -> (i32, i32) {
    %c0_i32 = arith.constant 0 : i32
    %c0_i32_0 = arith.constant 0 : i32
    return %arg0, %c0_i32 : i32, i32
  }
  func.func @transform_1(%arg0: i32, %arg1: i32) -> (i32, i32) {
    %c0_i32 = arith.constant 0 : i32
    %c0_i32_0 = arith.constant 0 : i32
    return %c0_i32, %arg1 : i32, i32
  }
  func.func @transform_2(%arg0: i32, %arg1: i32) -> (i32, i32) {
    %c0_i32 = arith.constant 0 : i32
    %c0_i32_0 = arith.constant 0 : i32
    return %c0_i32, %arg1 : i32, i32
  }
  func.func @transform_3(%arg0: i32, %arg1: i32) -> (i32, i32) {
    %c0_i32 = arith.constant 0 : i32
    %c0_i32_0 = arith.constant 0 : i32
    return %arg0, %c0_i32 : i32, i32
  }
  func.func @transform_4(%arg0: i32, %arg1: i32) -> (i32, i32) {
    %c0_i32 = arith.constant 0 : i32
    return %arg0, %arg1 : i32, i32
  }
}

</mosaic_0001>

<bundles_post_ra>
// kernel: tpu_custom_call.1
= control target key start
LH: loop header
LB: loop body
LE: loop exit
PB: predicated region body
PF: predicated region fallthrough
CT: control target
= control target key end

     0   :  { %9 = vsyncpa [#allocation3], 0  ;;  %s364_s0 = inlined_call_operand.vmem [shape: f32[8,128], index: 0, kind: input, shape index: {}]   ;;  %s365_s1 = inlined_call_operand.hbm [shape: f32[128,128], index: 1, kind: input, shape index: {}]   ;;  %s366_s2 = inlined_call_operand.vmem [shape: f32[1,128], index: 2, kind: input, shape index: {}]   ;;  %s367_s3 = inlined_call_operand.vmem [shape: s32[8,1], index: 3, kind: input, shape index: {}]   ;;  %s368_s4 = inlined_call_operand.hbm [shape: f32[8,128], index: 4, kind: output, shape index: {}]  }
   0x1   :  { %10 = vsyncpa [#allocation4], 0  ;;  %s298_s15 = smov [#allocation2]   ;;  %s250_s19 = scalar_lea.hbm %s365_s1, 2048 }
   0x2   :  { %s18_s16 = sshll.u32 %s298_s15, 4  ;;  %p251_p0 = scmp.ne.s32.totalorder %s365_s1, %s250_s19  ;;  %s19_s16 = int_to_ptr.vmem [resolvable:$true] %s18_s16 }
   0x3   :  { %p254_p1 = scmp.lt.u32.totalorder %s250_s19, %s365_s1 }
   0x5   :  { %p256_p2 = pnand %p254_p1, %p251_p0 }
   0x7   :  { %259 = shalt.err (!%p256_p2)
}
   0x8   :  { %s260_s24 = scalar_lea.vmem %s19_s16, 2048  ;;  %p265_p4 = scmp.lt.s32.totalorder %s19_s16, %s19_s16 }
   0x9   :  { %p261_p3 = scmp.ne.s32.totalorder %s19_s16, %s260_s24  ;;  %p266_p5 = scmp.lt.s32.totalorder %s260_s24, %s260_s24 }
   0xb   :  { %p267_p6 = por %p266_p5, %p265_p4 }
   0xd   :  { %p268_p7 = pnand %p267_p6, %p261_p3 }
   0xf   :  { %271 = shalt.err (!%p268_p7)
}
  0x10   :  { %s299_s25 = smov 128   ;;  %s300_s26 = smov 8  }
  0x11   :  { %24 = dma.hbm_to_vmem [thread:$0]  %s365_s1, 2048, %s19_s16, [#allocation3], %s299_s25, %s299_s25, %s300_s26  }
  0x12   :  { %294 = dma.done.wait [#allocation3], 2048  }
  0x13   :  { %295 = vsyncadd [#allocation3], 4294965248  ;;  %v301_v0 = vmov 0.0|0.0   ;;  %vm302_vm0 = vmmov 0   ;;  %v303_v1 = vmov 0.0   ;;  %v304_v2 = vmov 0  }
  0x14   :  { %215 = vmatprep.subr.bf16.mxu0 %v301_v0  ;;  %212 = vmatprep.mubr.msk.f32.mxu0 %vm302_vm0, %v303_v1  ;;  %v33_v3 = vld [vmem:[#allocation2] sm:$0xff]  ;;  %v34_v4 = vld [vmem:[#allocation2 + $0x8] sm:$0xff]  ;;  %v35_v5 = vld [vmem:[#allocation2 + $0x10] sm:$0xff]  ;;  %v134_v32 = vlaneseq }
  0x15   :  { %247 = vset.pattern.permute.xlu0 %v304_v2  ;;  %v216_v6 = vpack.c.bf16 %v34_v4, %v33_v3  ;;  %v36_v7 = vld [vmem:[#allocation2 + $0x18] sm:$0xff]  ;;  %v37_v9 = vld [vmem:[#allocation2 + $0x20] sm:$0xff]  ;;  %v38_v10 = vld [vmem:[#allocation2 + $0x28] sm:$0xff] }
  0x16   :  { %v219_v8 = vpack.c.bf16 %v36_v7, %v35_v5  ;;  %v32_v11 = vld [vmem:[%s364_s0] sm:$0xff]  ;;  %v222_v13 = vpack.c.bf16 %v38_v10, %v37_v9  ;;  %v39_v14 = vld [vmem:[#allocation2 + $0x30] sm:$0xff]  ;;  %v40_v15 = vld [vmem:[#allocation2 + $0x38] sm:$0xff]  ;;  %v135_v37 = vand.u32 127, %v134_v32 }
  0x17   :  { %217 = vmatpush3.bf16.msra.mxu0 %v216_v6  ;;  %v121_v12 = vmul.f32 %v32_v11, %v32_v11  ;;  %v225_v16 = vpack.c.bf16 %v40_v15, %v39_v14  ;;  %v41_v17 = vld [vmem:[#allocation2 + $0x40] sm:$0xff]  ;;  %v42_v18 = vld [vmem:[#allocation2 + $0x48] sm:$0xff]  ;;  %v43_v20 = vld [vmem:[#allocation2 + $0x50] sm:$0xff] }
  0x18   :  { %218 = vmatprep.subr.bf16.mxu0 %v301_v0  ;;  %v228_v19 = vpack.c.bf16 %v42_v18, %v41_v17  ;;  %v44_v21 = vld [vmem:[#allocation2 + $0x58] sm:$0xff]  ;;  %v45_v23 = vld [vmem:[#allocation2 + $0x60] sm:$0xff]  ;;  %v46_v24 = vld [vmem:[#allocation2 + $0x68] sm:$0xff] }
  0x19   :  { %122 = vadd.xlane.f32.xlu0 %v121_v12  ;;  %v231_v22 = vpack.c.bf16 %v44_v21, %v43_v20  ;;  %v234_v25 = vpack.c.bf16 %v46_v24, %v45_v23  ;;  %v47_v26 = vld [vmem:[#allocation2 + $0x70] sm:$0xff]  ;;  %v48_v27 = vld [vmem:[#allocation2 + $0x78] sm:$0xff]  ;;  %v50_v29 = vld [vmem:[%s367_s3] sm:$0xff]  ;;  %s305_s3 = smov [#allocation5]  }
  0x1a   :  { %v237_v28 = vpack.c.bf16 %v48_v27, %v47_v26  ;;  %v161_v33 = vld [vmem:[%s366_s2] ss:$0 sm:$0xff]  ;;  %s152_s7 = sshll.u32 %s305_s3, 4  ;;  %s153_s7 = int_to_ptr.vmem [resolvable:$true] %s152_s7 }
  0x1b   :  { %220 = vmatpush3.bf16.msra.mxu0 %v219_v8  ;;  %s272_s8 = scalar_lea.vmem %s153_s7, 128  ;;  %p277_p9 = scmp.lt.s32.totalorder %s153_s7, %s153_s7 }
  0x1c   :  { %221 = vmatprep.subr.bf16.mxu0 %v301_v0  ;;  %p273_p8 = scmp.ne.s32.totalorder %s153_s7, %s272_s8  ;;  %p278_p10 = scmp.lt.s32.totalorder %s272_s8, %s272_s8 }
  0x1e   :  { %p279_p11 = por %p278_p10, %p277_p9 }
  0x1f   :  { %223 = vmatpush3.bf16.msra.mxu0 %v222_v13 }
  0x20   :  { %224 = vmatprep.subr.bf16.mxu0 %v301_v0  ;;  %p280_p12 = pnand %p279_p11, %p273_p8 }
  0x23   :  { %226 = vmatpush3.bf16.msra.mxu0 %v225_v16 }
  0x24   :  { %227 = vmatprep.subr.bf16.mxu0 %v301_v0 }
  0x27   :  { %229 = vmatpush3.bf16.msra.mxu0 %v228_v19 }
  0x28   :  { %230 = vmatprep.subr.bf16.mxu0 %v301_v0 }
  0x2b   :  { %232 = vmatpush3.bf16.msra.mxu0 %v231_v22 }
  0x2c   :  { %233 = vmatprep.subr.bf16.mxu0 %v301_v0 }
  0x2f   :  { %235 = vmatpush3.bf16.msra.mxu0 %v234_v25  ;;  %140 = vperm.xlu0 %247, %v50_v29  }
  0x30   :  { %236 = vmatprep.subr.bf16.mxu0 %v301_v0 }
  0x33   :  { %238 = vmatpush3.bf16.msra.mxu0 %v237_v28 }
  0x36   :  { %213 = vmatmul.mubr.f32.vlgmr.msra.gmra.mrb[0].mxu0 %v32_v11 }
  0xa6   :  { %v123_v30 = vpop.xlane.xlu0 %122 }
  0xa7   :  { %248 = vrsqrt.f32 %v123_v30 }
  0xae   :  { %v141_v39 = vpop.permute.xlu0 %140 }
  0xaf   :  { %vm142_vm1 = vcmp.eq.s32.totalorder %v135_v37, %v141_v39 }
  0xb1   :  { %v249_v31 = vpop.eup %248 }
 0x109   :  { %v117_v34 = vpop.f32.mrb[0].mxu0 }
 0x10a   :  { %v125_v35 = vmul.f32 %v249_v31, %v117_v34  ;;  %v214_v36 = vpop.f32.mrb[1].mxu0 }
 0x10c   :  { %v132_v38 = vmul.f32 %v161_v33, %v125_v35 }
 0x10e   :  { %v138_v40 = vmul.f32 100.0, %v132_v38 }
 0x110   :  { %v162_v41 = vadd.f32 -61.82, %v138_v40 }
 0x112   :  { %v144_v42 = vsel %vm142_vm1, %v162_v41, %v138_v40 }
 0x113   :  { %145 = vst [vmem:[#allocation5] sm:$0xff] %v144_v42 }
 0x114   :  { %283 = shalt.err (!%p280_p12)
}
 0x115   :  { %s284_s10 = scalar_lea.hbm %s368_s4, 128 }
 0x116   :  { %p285_p13 = scmp.ne.s32.totalorder %s368_s4, %s284_s10  ;;  %p288_p0 = scmp.lt.u32.totalorder %s284_s10, %s368_s4 }
 0x118   :  { %p290_p1 = pnand %p288_p0, %p285_p13 }
 0x11a   :  { %293 = shalt.err (!%p290_p1)
}
 0x11b   :  { %155 = dma.vmem_to_hbm [thread:$0]  %s153_s7, 128, %s368_s4, [#allocation4]  }
 0x11c   :  { %296 = dma.done.wait [#allocation4], 128  }
 0x11d   :  { %297 = vsyncadd [#allocation4], 4294967168 }
 0x11e   :  { %159 = vsyncpa [#allocation3], 1 }
 0x11f   :  { %160 = vsyncpa [#allocation4], 1 }

</bundles_post_ra>
